<compile_context>
chip_gen: v7x
topology: tpu7x:2x2x1
jax: 0.10.0
libtpu: 0.0.40
codegen_flags: <defaults>
</compile_context>

<pallas_src>
import functools

import jax
import jax.numpy as jnp
from jax.experimental import pallas as pl
from jax.experimental.pallas import tpu as pltpu


def _cdiv(a, b):
    return -(-a // b)


def _choose_batch_tiling(batch, *, tb_max=2048, min_tiles=2):
    """Pick (tb, n_tiles, B_pad) for a batch-on-the-lane-axis layout.

    * tb is a multiple of 128 (lane width) so every tile is lane-dense.
    * Padding is minimized (picks whichever tile size yields the smallest
      padded batch), never anywhere near a whole large tile.
    * n_tiles >= min_tiles whenever batch >= min_tiles*128 so the "parallel"
      grid axis can shard across both TensorCores on v7x.
    """
    chunks = _cdiv(max(batch, 1), 128)              # number of 128-row lane groups
    max_chunks_per_tile = max(1, tb_max // 128)
    n_tiles = max(_cdiv(chunks, max_chunks_per_tile), min(min_tiles, chunks))

    # Two candidate tile sizes (floor / ceil split); keep the one with the
    # smallest padded batch, preferring more (smaller) tiles on ties.
    candidates = []
    for tb_chunks in {max(1, chunks // n_tiles), _cdiv(chunks, n_tiles)}:
        nt = _cdiv(chunks, tb_chunks)
        candidates.append((nt * tb_chunks, tb_chunks, nt))
    padded_chunks, tb_chunks, n_tiles = min(candidates)

    tb = 128 * tb_chunks
    return tb, n_tiles, 128 * padded_chunks


def _fused_laguerre_kan_kernel(x_ref, *refs, degree, alpha, eps, num_layers):
    """Fused stack of LaguerreKANLayerNorm layers, feature-major layout.

    refs = [w_0, gamma_0, beta_0, ..., w_{L-1}, gamma_{L-1}, beta_{L-1}, o_ref]
      w_l:     (O_l, (degree+1) * I_l)   d-major flattened laguerre_coeffs
      gamma_l: (O_l, 1)                  LayerNorm weight
      beta_l:  (O_l, 1)                  LayerNorm bias
      o_ref:   (O_last, tb)              output tile (batch on lanes)
    """
    o_ref = refs[-1]
    h = x_ref[...].astype(jnp.float32)                      # (I_0, tb)

    for l in range(num_layers):
        w_ref = refs[3 * l]
        g_ref = refs[3 * l + 1]
        b_ref = refs[3 * l + 2]

        t = jnp.tanh(h)                                     # (I_l, tb), lane-dense

        # Laguerre recurrence in f32 on the VPU (divide -> mul by 1/k const).
        polys = [jnp.ones_like(t)]                          # L0 = 1
        if degree > 0:
            polys.append((1.0 + alpha) - t)                 # L1 = 1 + a - x
        for k in range(2, degree + 1):
            c1 = 2.0 * (k - 1) + 1.0 + alpha
            c2 = (k - 1.0) + alpha
            inv_k = 1.0 / float(k)
            polys.append(((c1 - t) * polys[-1] - c2 * polys[-2]) * inv_k)

        # Sublane-stack the degree axis -> single wide-K MXU matmul with N=tb.
        lag = jnp.concatenate(polys, axis=0)                # ((D+1)*I_l, tb)
        y = jnp.dot(w_ref[...], lag.astype(w_ref.dtype),
                    preferred_element_type=jnp.float32)     # (O_l, tb)

        # LayerNorm over the feature (sublane) axis; biased variance, affine.
        mean = jnp.mean(y, axis=0, keepdims=True)           # (1, tb)
        centered = y - mean
        var = jnp.mean(centered * centered, axis=0, keepdims=True)
        h = centered * jax.lax.rsqrt(var + eps)
        h = h * g_ref[...] + b_ref[...]                     # (O_l, 1) broadcast

    o_ref[...] = h.astype(o_ref.dtype)                      # full-width lane store


def laguerre_kan_forward(x, params, *, degree, alpha, eps=1e-5,
                         tb_max=2048, min_tiles=2):
    """Full Laguerre_KAN forward as a single fused Pallas kernel.

    x:      (..., I_0) float32 (flattened to rows, like x.view(-1, input_dim))
    params: list of (W, gamma, beta) with W: (O_l, (degree+1)*I_l)
            (W may be bf16 for faster MXU issue on v6e/v7x; accumulation is f32)
    returns (B, O_last) in x.dtype
    """
    in_dim0 = params[0][0].shape[1] // (degree + 1)
    x = x.reshape(-1, in_dim0)
    B = x.shape[0]
    out_dim = params[-1][0].shape[0]

    tb, n_tiles, B_pad = _choose_batch_tiling(B, tb_max=tb_max, min_tiles=min_tiles)

    # Feature-major: batch on the lane (last) axis.  Padding is < 2*128 rows.
    xt = x.T                                                # (I_0, B)
    if B_pad != B:
        xt = jnp.pad(xt, ((0, 0), (0, B_pad - B)))

    flat_inputs = [xt]
    in_specs = [pl.BlockSpec((in_dim0, tb), lambda i: (0, i))]
    for (W, gamma, beta) in params:
        O, K = W.shape
        flat_inputs += [W, gamma.reshape(O, 1), beta.reshape(O, 1)]
        in_specs += [
            pl.BlockSpec((O, K), lambda i: (0, 0)),   # whole weight, VMEM-resident
            pl.BlockSpec((O, 1), lambda i: (0, 0)),   # LN gamma
            pl.BlockSpec((O, 1), lambda i: (0, 0)),   # LN beta
        ]

    kernel = functools.partial(
        _fused_laguerre_kan_kernel,
        degree=degree, alpha=alpha, eps=eps, num_layers=len(params))

    out_t = pl.pallas_call(
        kernel,
        out_shape=jax.ShapeDtypeStruct((out_dim, B_pad), x.dtype),
        grid_spec=pltpu.PrefetchScalarGridSpec(
            num_scalar_prefetch=0,
            grid=(n_tiles,),
            in_specs=in_specs,
            out_specs=pl.BlockSpec((out_dim, tb), lambda i: (0, i)),
        ),
        compiler_params=pltpu.CompilerParams(
            dimension_semantics=("parallel",)),
    )(*flat_inputs)

    return out_t.T[:B]                                      # back to (B, O_last)


def init_laguerre_kan_params(key, layers_hidden, degree, *, mxu_dtype=jnp.float32):
    """Deterministic init matching the PyTorch module's __init__.

    PyTorch stores laguerre_coeffs as (input_dim, output_dim, degree+1); we
    pre-transpose to (output_dim, (degree+1)*input_dim) d-major so the kernel
    does one wide-K, N=tb matmul per layer (W @ lag).
    """
    params = []
    for in_dim, out_dim in zip(layers_hidden[:-1], layers_hidden[1:]):
        key, sub = jax.random.split(key)
        std = 1.0 / (in_dim * (degree + 1))
        coeffs_iod = std * jax.random.normal(
            sub, (in_dim, out_dim, degree + 1), dtype=jnp.float32)
        # (I, O, D+1) -> (O, D+1, I) -> (O, (D+1)*I); col d*I + i == C[i, o, d]
        w = jnp.transpose(coeffs_iod, (1, 2, 0)).reshape(
            out_dim, (degree + 1) * in_dim).astype(mxu_dtype)
        gamma = jnp.ones((out_dim,), jnp.float32)   # nn.LayerNorm defaults
        beta = jnp.zeros((out_dim,), jnp.float32)
        params.append((w, gamma, beta))
    return params


def _reference_forward(x, params, *, degree, alpha, eps=1e-5):
    """Pure-JAX reference mirroring the PyTorch semantics."""
    for (w, gamma, beta) in params:
        out_dim, K = w.shape
        in_dim = K // (degree + 1)
        x = x.reshape(-1, in_dim)
        t = jnp.tanh(x)
        polys = [jnp.ones_like(t)]
        if degree > 0:
            polys.append(1.0 + alpha - t)
        for k in range(2, degree + 1):
            term1 = (2 * (k - 1) + 1 + alpha - t) * polys[k - 1]
            term2 = (k - 1 + alpha) * polys[k - 2]
            polys.append((term1 - term2) / k)
        lag = jnp.stack(polys, axis=-1)                          # (B, I, D+1)
        coeffs_iod = jnp.transpose(
            w.astype(jnp.float32).reshape(out_dim, degree + 1, in_dim),
            (2, 0, 1))                                           # (I, O, D+1)
        y = jnp.einsum('bid,iod->bo', lag, coeffs_iod)
        mean = jnp.mean(y, axis=-1, keepdims=True)
        var = jnp.mean((y - mean) ** 2, axis=-1, keepdims=True)
        x = (y - mean) / jnp.sqrt(var + eps) * gamma + beta
    return x


if __name__ == "__main__":
    degree = 3
    alpha = -0.5
    layers_hidden = [32, 64, 16]
    batch = 300   # not a multiple of 128 -> exercises the padded-tail tiling

    key = jax.random.PRNGKey(0)
    key, kx = jax.random.split(key)
    x = jax.random.normal(kx, (batch, layers_hidden[0]), dtype=jnp.float32)

    params = init_laguerre_kan_params(key, layers_hidden, degree)

    out = laguerre_kan_forward(x, params, degree=degree, alpha=alpha)
    out = jax.block_until_ready(out)

    ref = _reference_forward(x, params, degree=degree, alpha=alpha)
    assert out.shape == (batch, layers_hidden[-1])
    assert jnp.allclose(out, ref, atol=5e-4, rtol=5e-4), "mismatch vs reference"

    # Optional bf16-MXU-operand path (recommended on v6e/v7x; f32 accumulation).
    # TODO(synk): tighten bf16 validation against a per-deployment tolerance.
    params_bf16 = [(w.astype(jnp.bfloat16), g, b) for (w, g, b) in params]
    out_bf16 = jax.block_until_ready(
        laguerre_kan_forward(x, params_bf16, degree=degree, alpha=alpha))
    assert out_bf16.shape == (batch, layers_hidden[-1])
    assert bool(jnp.isfinite(out_bf16).all())

    print("KERNEL_OK")
</pallas_src>

<mosaic_0001>
module attributes {stable_mosaic.version = 11 : i64} {
  func.func @_fused_laguerre_kan_kernel(%arg0: i32, %arg1: memref<32x128xf32, #tpu.memory_space<vmem>>, %arg2: memref<64x128xf32, #tpu.memory_space<vmem>>, %arg3: memref<64x1xf32, #tpu.memory_space<vmem>>, %arg4: memref<64x1xf32, #tpu.memory_space<vmem>>, %arg5: memref<16x256xf32, #tpu.memory_space<vmem>>, %arg6: memref<16x1xf32, #tpu.memory_space<vmem>>, %arg7: memref<16x1xf32, #tpu.memory_space<vmem>>, %arg8: memref<16x128xf32, #tpu.memory_space<vmem>>) attributes {dimension_semantics = [#tpu.dimension_semantics<parallel>], iteration_bounds = array<i64: 3>, scalar_prefetch = 0 : i64, scratch_operands = 0 : i64, tpu.core_type = #tpu.core_type<tc>, window_params = [{transform_indices = @transform_0, window_bounds = array<i64: 32, 128>}, {pipeline_mode = #tpu.pipeline_mode<synchronous>, transform_indices = @transform_1, window_bounds = array<i64: 64, 128>}, {pipeline_mode = #tpu.pipeline_mode<synchronous>, transform_indices = @transform_2, window_bounds = array<i64: 64, 1>}, {pipeline_mode = #tpu.pipeline_mode<synchronous>, transform_indices = @transform_3, window_bounds = array<i64: 64, 1>}, {pipeline_mode = #tpu.pipeline_mode<synchronous>, transform_indices = @transform_4, window_bounds = array<i64: 16, 256>}, {pipeline_mode = #tpu.pipeline_mode<synchronous>, transform_indices = @transform_5, window_bounds = array<i64: 16, 1>}, {pipeline_mode = #tpu.pipeline_mode<synchronous>, transform_indices = @transform_6, window_bounds = array<i64: 16, 1>}, {transform_indices = @transform_7, window_bounds = array<i64: 16, 128>}]} {
    %c0 = arith.constant 0 : index
    %c0_0 = arith.constant 0 : index
    %0 = vector.load %arg1[%c0, %c0_0] : memref<32x128xf32, #tpu.memory_space<vmem>>, vector<32x128xf32>
    %1 = math.tanh %0 : vector<32x128xf32>
    %cst = arith.constant 1.000000e+00 : f32
    %2 = vector.broadcast %cst : f32 to vector<32x128xf32>
    %cst_1 = arith.constant 5.000000e-01 : f32
    %3 = vector.broadcast %cst_1 : f32 to vector<32x128xf32>
    %4 = arith.subf %3, %1 : vector<32x128xf32>
    %cst_2 = arith.constant 2.500000e+00 : f32
    %5 = vector.broadcast %cst_2 : f32 to vector<32x128xf32>
    %6 = arith.subf %5, %1 : vector<32x128xf32>
    %7 = arith.mulf %6, %4 : vector<32x128xf32>
    %cst_3 = arith.constant 5.000000e-01 : f32
    %8 = vector.broadcast %cst_3 : f32 to vector<32x128xf32>
    %9 = arith.mulf %8, %2 : vector<32x128xf32>
    %10 = arith.subf %7, %9 : vector<32x128xf32>
    %cst_4 = arith.constant 5.000000e-01 : f32
    %11 = vector.broadcast %cst_4 : f32 to vector<32x128xf32>
    %12 = arith.mulf %10, %11 : vector<32x128xf32>
    %cst_5 = arith.constant 4.500000e+00 : f32
    %13 = vector.broadcast %cst_5 : f32 to vector<32x128xf32>
    %14 = arith.subf %13, %1 : vector<32x128xf32>
    %15 = arith.mulf %14, %12 : vector<32x128xf32>
    %cst_6 = arith.constant 1.500000e+00 : f32
    %16 = vector.broadcast %cst_6 : f32 to vector<32x128xf32>
    %17 = arith.mulf %16, %4 : vector<32x128xf32>
    %18 = arith.subf %15, %17 : vector<32x128xf32>
    %cst_7 = arith.constant 0.333333343 : f32
    %19 = vector.broadcast %cst_7 : f32 to vector<32x128xf32>
    %20 = arith.mulf %18, %19 : vector<32x128xf32>
    %21 = tpu.concatenate %2, %4, %12, %20 in 0 : vector<32x128xf32>, vector<32x128xf32>, vector<32x128xf32>, vector<32x128xf32> -> vector<128x128xf32>
    %c0_8 = arith.constant 0 : index
    %c0_9 = arith.constant 0 : index
    %22 = vector.load %arg2[%c0_8, %c0_9] : memref<64x128xf32, #tpu.memory_space<vmem>>, vector<64x128xf32>
    %cst_10 = arith.constant dense<0.000000e+00> : vector<64x128xf32>
    %23 = tpu.matmul %22, %21, %cst_10 {dimension_numbers = #tpu.dot_dimension_numbers<[1], [0], [0], [1], [0, 0, 1, 1], [], []>} : vector<64x128xf32>, vector<128x128xf32>, vector<64x128xf32> -> vector<64x128xf32>
    %cst_11 = arith.constant dense<0.000000e+00> : vector<128xf32>
    %24 = vector.multi_reduction <add>, %23, %cst_11 [0] : vector<64x128xf32> to vector<128xf32>
    %25 = vector.shape_cast %24 : vector<128xf32> to vector<1x128xf32>
    %cst_12 = arith.constant 6.400000e+01 : f32
    %26 = vector.broadcast %cst_12 : f32 to vector<1x128xf32>
    %27 = arith.divf %25, %26 : vector<1x128xf32>
    %28 = vector.broadcast %27 : vector<1x128xf32> to vector<64x128xf32>
    %29 = arith.subf %23, %28 : vector<64x128xf32>
    %30 = arith.mulf %29, %29 : vector<64x128xf32>
    %cst_13 = arith.constant dense<0.000000e+00> : vector<128xf32>
    %31 = vector.multi_reduction <add>, %30, %cst_13 [0] : vector<64x128xf32> to vector<128xf32>
    %32 = vector.shape_cast %31 : vector<128xf32> to vector<1x128xf32>
    %cst_14 = arith.constant 6.400000e+01 : f32
    %33 = vector.broadcast %cst_14 : f32 to vector<1x128xf32>
    %34 = arith.divf %32, %33 : vector<1x128xf32>
    %cst_15 = arith.constant 9.99999974E-6 : f32
    %35 = vector.broadcast %cst_15 : f32 to vector<1x128xf32>
    %36 = arith.addf %34, %35 : vector<1x128xf32>
    %37 = math.rsqrt %36 : vector<1x128xf32>
    %38 = vector.broadcast %37 : vector<1x128xf32> to vector<64x128xf32>
    %39 = arith.mulf %29, %38 : vector<64x128xf32>
    %c0_16 = arith.constant 0 : index
    %c0_17 = arith.constant 0 : index
    %40 = vector.load %arg3[%c0_16, %c0_17] : memref<64x1xf32, #tpu.memory_space<vmem>>, vector<64x1xf32>
    %41 = vector.broadcast %40 : vector<64x1xf32> to vector<64x128xf32>
    %42 = arith.mulf %39, %41 : vector<64x128xf32>
    %c0_18 = arith.constant 0 : index
    %c0_19 = arith.constant 0 : index
    %43 = vector.load %arg4[%c0_18, %c0_19] : memref<64x1xf32, #tpu.memory_space<vmem>>, vector<64x1xf32>
    %44 = vector.broadcast %43 : vector<64x1xf32> to vector<64x128xf32>
    %45 = arith.addf %42, %44 : vector<64x128xf32>
    %46 = math.tanh %45 : vector<64x128xf32>
    %cst_20 = arith.constant 1.000000e+00 : f32
    %47 = vector.broadcast %cst_20 : f32 to vector<64x128xf32>
    %cst_21 = arith.constant 5.000000e-01 : f32
    %48 = vector.broadcast %cst_21 : f32 to vector<64x128xf32>
    %49 = arith.subf %48, %46 : vector<64x128xf32>
    %cst_22 = arith.constant 2.500000e+00 : f32
    %50 = vector.broadcast %cst_22 : f32 to vector<64x128xf32>
    %51 = arith.subf %50, %46 : vector<64x128xf32>
    %52 = arith.mulf %51, %49 : vector<64x128xf32>
    %cst_23 = arith.constant 5.000000e-01 : f32
    %53 = vector.broadcast %cst_23 : f32 to vector<64x128xf32>
    %54 = arith.mulf %53, %47 : vector<64x128xf32>
    %55 = arith.subf %52, %54 : vector<64x128xf32>
    %cst_24 = arith.constant 5.000000e-01 : f32
    %56 = vector.broadcast %cst_24 : f32 to vector<64x128xf32>
    %57 = arith.mulf %55, %56 : vector<64x128xf32>
    %cst_25 = arith.constant 4.500000e+00 : f32
    %58 = vector.broadcast %cst_25 : f32 to vector<64x128xf32>
    %59 = arith.subf %58, %46 : vector<64x128xf32>
    %60 = arith.mulf %59, %57 : vector<64x128xf32>
    %cst_26 = arith.constant 1.500000e+00 : f32
    %61 = vector.broadcast %cst_26 : f32 to vector<64x128xf32>
    %62 = arith.mulf %61, %49 : vector<64x128xf32>
    %63 = arith.subf %60, %62 : vector<64x128xf32>
    %cst_27 = arith.constant 0.333333343 : f32
    %64 = vector.broadcast %cst_27 : f32 to vector<64x128xf32>
    %65 = arith.mulf %63, %64 : vector<64x128xf32>
    %66 = tpu.concatenate %47, %49, %57, %65 in 0 : vector<64x128xf32>, vector<64x128xf32>, vector<64x128xf32>, vector<64x128xf32> -> vector<256x128xf32>
    %c0_28 = arith.constant 0 : index
    %c0_29 = arith.constant 0 : index
    %67 = vector.load %arg5[%c0_28, %c0_29] : memref<16x256xf32, #tpu.memory_space<vmem>>, vector<16x256xf32>
    %cst_30 = arith.constant dense<0.000000e+00> : vector<16x128xf32>
    %68 = tpu.matmul %67, %66, %cst_30 {dimension_numbers = #tpu.dot_dimension_numbers<[1], [0], [0], [1], [0, 0, 1, 1], [], []>} : vector<16x256xf32>, vector<256x128xf32>, vector<16x128xf32> -> vector<16x128xf32>
    %cst_31 = arith.constant dense<0.000000e+00> : vector<128xf32>
    %69 = vector.multi_reduction <add>, %68, %cst_31 [0] : vector<16x128xf32> to vector<128xf32>
    %70 = vector.shape_cast %69 : vector<128xf32> to vector<1x128xf32>
    %cst_32 = arith.constant 1.600000e+01 : f32
    %71 = vector.broadcast %cst_32 : f32 to vector<1x128xf32>
    %72 = arith.divf %70, %71 : vector<1x128xf32>
    %73 = vector.broadcast %72 : vector<1x128xf32> to vector<16x128xf32>
    %74 = arith.subf %68, %73 : vector<16x128xf32>
    %75 = arith.mulf %74, %74 : vector<16x128xf32>
    %cst_33 = arith.constant dense<0.000000e+00> : vector<128xf32>
    %76 = vector.multi_reduction <add>, %75, %cst_33 [0] : vector<16x128xf32> to vector<128xf32>
    %77 = vector.shape_cast %76 : vector<128xf32> to vector<1x128xf32>
    %cst_34 = arith.constant 1.600000e+01 : f32
    %78 = vector.broadcast %cst_34 : f32 to vector<1x128xf32>
    %79 = arith.divf %77, %78 : vector<1x128xf32>
    %cst_35 = arith.constant 9.99999974E-6 : f32
    %80 = vector.broadcast %cst_35 : f32 to vector<1x128xf32>
    %81 = arith.addf %79, %80 : vector<1x128xf32>
    %82 = math.rsqrt %81 : vector<1x128xf32>
    %83 = vector.broadcast %82 : vector<1x128xf32> to vector<16x128xf32>
    %84 = arith.mulf %74, %83 : vector<16x128xf32>
    %c0_36 = arith.constant 0 : index
    %c0_37 = arith.constant 0 : index
    %85 = vector.load %arg6[%c0_36, %c0_37] : memref<16x1xf32, #tpu.memory_space<vmem>>, vector<16x1xf32>
    %86 = vector.broadcast %85 : vector<16x1xf32> to vector<16x128xf32>
    %87 = arith.mulf %84, %86 : vector<16x128xf32>
    %c0_38 = arith.constant 0 : index
    %c0_39 = arith.constant 0 : index
    %88 = vector.load %arg7[%c0_38, %c0_39] : memref<16x1xf32, #tpu.memory_space<vmem>>, vector<16x1xf32>
    %89 = vector.broadcast %88 : vector<16x1xf32> to vector<16x128xf32>
    %90 = arith.addf %87, %89 : vector<16x128xf32>
    %c0_40 = arith.constant 0 : index
    %c0_41 = arith.constant 0 : index
    %91 = vector.load %arg8[%c0_40, %c0_41] : memref<16x128xf32, #tpu.memory_space<vmem>>, vector<16x128xf32>
    tpu.vector_store %arg8[%c0_40, %c0_41], %90 {strides = array<i32>} : memref<16x128xf32, #tpu.memory_space<vmem>>, vector<16x128xf32>,
    return
  }
  func.func @transform_0(%arg0: i32) -> (i32, i32) {
    %c0_i32 = arith.constant 0 : i32
    %c0_i32_0 = arith.constant 0 : i32
    return %c0_i32, %arg0 : i32, i32
  }
  func.func @transform_1(%arg0: i32) -> (i32, i32) {
    %c0_i32 = arith.constant 0 : i32
    %c0_i32_0 = arith.constant 0 : i32
    %c0_i32_1 = arith.constant 0 : i32
    return %c0_i32, %c0_i32_0 : i32, i32
  }
  func.func @transform_2(%arg0: i32) -> (i32, i32) {
    %c0_i32 = arith.constant 0 : i32
    %c0_i32_0 = arith.constant 0 : i32
    %c0_i32_1 = arith.constant 0 : i32
    return %c0_i32, %c0_i32_0 : i32, i32
  }
  func.func @transform_3(%arg0: i32) -> (i32, i32) {
    %c0_i32 = arith.constant 0 : i32
    %c0_i32_0 = arith.constant 0 : i32
    %c0_i32_1 = arith.constant 0 : i32
    return %c0_i32, %c0_i32_0 : i32, i32
  }
  func.func @transform_4(%arg0: i32) -> (i32, i32) {
    %c0_i32 = arith.constant 0 : i32
    %c0_i32_0 = arith.constant 0 : i32
    %c0_i32_1 = arith.constant 0 : i32
    return %c0_i32, %c0_i32_0 : i32, i32
  }
  func.func @transform_5(%arg0: i32) -> (i32, i32) {
    %c0_i32 = arith.constant 0 : i32
    %c0_i32_0 = arith.constant 0 : i32
    %c0_i32_1 = arith.constant 0 : i32
    return %c0_i32, %c0_i32_0 : i32, i32
  }
  func.func @transform_6(%arg0: i32) -> (i32, i32) {
    %c0_i32 = arith.constant 0 : i32
    %c0_i32_0 = arith.constant 0 : i32
    %c0_i32_1 = arith.constant 0 : i32
    return %c0_i32, %c0_i32_0 : i32, i32
  }
  func.func @transform_7(%arg0: i32) -> (i32, i32) {
    %c0_i32 = arith.constant 0 : i32
    %c0_i32_0 = arith.constant 0 : i32
    return %c0_i32, %arg0 : i32, i32
  }
}

</mosaic_0001>

<bundles_post_ra>
// kernel: tpu_custom_call.1
= control target key start
LH: loop header
LB: loop body
LE: loop exit
PB: predicated region body
PF: predicated region fallthrough
CT: control target
= control target key end

     0   :  { %12 = vsyncpa [#allocation4], 0  ;;  %s1678_s0 = inlined_call_operand.vmem [shape: f32[32,384], index: 0, kind: input, shape index: {}]   ;;  %s1679_s1 = inlined_call_operand.vmem [shape: f32[64,128], index: 1, kind: input, shape index: {}]   ;;  %s1680_s2 = inlined_call_operand.vmem [shape: f32[64,1], index: 2, kind: input, shape index: {}]   ;;  %s1681_s3 = inlined_call_operand.vmem [shape: f32[64,1], index: 3, kind: input, shape index: {}]   ;;  %s1682_s4 = inlined_call_operand.hbm [shape: f32[16,256], index: 4, kind: input, shape index: {}]   ;;  %s1683_s5 = inlined_call_operand.vmem [shape: f32[16,1], index: 5, kind: input, shape index: {}]   ;;  %s1684_s6 = inlined_call_operand.vmem [shape: f32[16,1], index: 6, kind: input, shape index: {}]   ;;  %s1685_s7 = inlined_call_operand.hbm [shape: f32[16,384], index: 7, kind: output, shape index: {}]  }
   0x1   :  { %13 = vsyncpa [#allocation5], 0 }
   0x2   :  { %15 = vsyncpa [#allocation5 + $0x1], 0  ;;  %s1401_s24 = smov 0   ;;  %s1403_s25 = smov 0  }
   0x3   :  { %s1405_s26 = smov 0   ;;  %s1407_s27 = smov 0  }
   0x4 LB: > { %s1422_s28 = sadd.s32 4294967295, %s1350_s27   ;;  %s981_s29 = sadd.s32 4294967294, %s1350_s27   ;;  %s1350_s27 = sphi %s1407_s27, %s1703_s27   ;;  %s1346_s26 = sphi %s1405_s26, %s1702_s26   ;;  %s1342_s25 = sphi %s1403_s25, %s1701_s25   ;;  %s1338_s24 = sphi %s1401_s24, %s1700_s24  }
   0x5   : > { %s1426_s30 = sadd.s32 1, %s1350_s27   ;;  %s28_s8 = sadd.s32 1, %s1346_s26 }
   0x6   : > { %s25_s9 = ssub.s32 %s1350_s27, %s1426_s30  ;;  %p35_p0 = scmp.ne.s32.totalorder %s1346_s26, %s1342_s25 }
   0x7   : > { %p26_p1 = scmp.eq.s32.totalorder %s25_s9, 0  ;;  %p36_p2 = scmp.eq.s32.totalorder %s1350_s27, 0 }
   0x8   : > { %p191_p3 = scmp.eq.s32.totalorder %s1422_s28, 2  ;;  %p196_p4 = scmp.ne.s32.totalorder %s1342_s25, %s1338_s24 }
   0x9   : > { %s1438_s10 = scalar_select %p26_p1, %s1346_s26, %s28_s8  }
   0xa   : > { %p1440_p5 = por %p36_p2, %p35_p0  ;;  %p1444_p6 = por %p191_p3, %p35_p0 }
   0xb   : > { %p197_p7 = scmp.eq.s32.totalorder %s981_s29, 2  ;;  %p982_p8 = scmp.ge.s32.totalorder %s1350_s27, 1 }
   0xc   : > { %s1689_s11 = scalar_select %p1440_p5, 1, 0 }
   0xd   : > { %s1690_s12 = scalar_select %p1444_p6, 1, 0 }
   0xe   : > { %p204_p9 = scmp.lt.s32.totalorder %s1350_s27, 4  ;;  %p1450_p10 = por %p197_p7, %p196_p4 }
   0xf   : > { %p1686_p11 = scmp.eq.s32.totalorder %s1422_s28, 0  ;;  %s1352_s15 = smov [#allocation3]  }
  0x10   : > { %s1691_s13 = scalar_select %p1450_p10, 1, 0 }
  0x11   : > { %p1455_p12 = pnand %p982_p8, %p204_p9  ;;  %s225_s16 = sshll.u32 %s1352_s15, 4  ;;  %s226_s16 = int_to_ptr.vmem [resolvable:$true] %s225_s16 }
  0x12   : > { %s1256_s20 = scalar_lea.hbm %s1682_s4, 512 }
  0x13   : > { %s1692_s14 = scalar_select %p1455_p12, 1, 0 }
  0x14   : > { %p1175_p13 = pneg %p1455_p12  ;;  %p1257_p1 = scmp.ne.s32.totalorder %s1682_s4, %s1256_s20 }
  0x15   : > { %p1263_p7 = scmp.lt.u32.totalorder %s1256_s20, %s1682_s4 }
  0x16   : > { %p1463_p0 = pnand %p1686_p11, %p1175_p13 }
  0x18   : > { %p1258_p2 = pneg %p1463_p0 }
  0x1a   : > { %p1259_p3 = pnand %p1258_p2, %p1257_p1 }
  0x1c   : > { %p1260_p4 = pneg %p1259_p3 }
  0x1e   : > { %p1265_p8 = pnand %p1263_p7, %p1260_p4 }
  0x20   : > { %1268 = shalt.err (!%p1265_p8)
}
  0x21   : > { %s1269_s8 = scalar_lea.vmem %s226_s16, 512  ;;  %p1277_p10 = scmp.lt.s32.totalorder %s226_s16, %s226_s16 }
  0x22   : > { %p1270_p9 = scmp.ne.s32.totalorder %s226_s16, %s1269_s8  ;;  %p1278_p6 = scmp.lt.s32.totalorder %s1269_s8, %s1269_s8 }
  0x24   : > { %p1272_p13 = pnand %p1270_p9, %p1258_p2  ;;  %p1279_p12 = por %p1278_p6, %p1277_p10 }
  0x26   : > { %p1273_p11 = pneg %p1272_p13 }
  0x28   : > { %p1280_p5 = pnand %p1279_p12, %p1273_p11 }
  0x2a   : > { %1283 = shalt.err (!%p1280_p5)
}
  0x2b   : > { %s1353_s9 = smov 256   ;;  %s1354_s15 = smov 16  }
  0x2c   : > { %1178 = dma.hbm_to_vmem [thread:$0]  (!%p1463_p0), %s1682_s4, 512, %s226_s16, [#allocation4], %s1353_s9, %s1353_s9, %s1354_s15  }
  0x2d   : > { %p984_p1 = scmp.ge.s32.totalorder %s1350_s27, 3 }
  0x2e   : > { %p1694_p3 = scmp.ne.s32.totalorder (!%p984_p1), %s1689_s11, 0 }
  0x2f   : > { %241 = sbr.rel (%p984_p1) target bundleno = 61 (0x3d), region = 40 }
  0x36   : > { %244 = sbr.rel (!%p1694_p3) target bundleno = 61 (0x3d), region = 44  ;;  %s246_s20 = sand.u32 (%p1694_p3), 1, %s1346_s26  }
  0x37   : > { %s986_s21 = sshll.u32 (%p1694_p3), %s1350_s27, 3  ;;  %s985_s22 = sshll.u32 (%p1694_p3), %s246_s20, 5 }
  0x38   : > { %s250_s8 = scalar_lea.vmem (%p1694_p3), %s1678_s0, %s986_s21  ;;  %s248_s17 = scalar_lea.vmem (%p1694_p3), [#allocation2], %s985_s22 }
  0x39   : > { %v284_v0 = vld [vmem:[%s250_s8] sm:$0xff] (%p1694_p3)  ;;  %v286_v1 = vld [vmem:[%s250_s8 + $0x18] sm:$0xff] (%p1694_p3)  ;;  %v288_v2 = vld [vmem:[%s250_s8 + $0x30] sm:$0xff] (%p1694_p3) }
  0x3a   : > { %285 = vst [vmem:[%s248_s17] sm:$0xff] (%p1694_p3), %v284_v0  ;;  %287 = vst [vmem:[%s248_s17 + $0x8] sm:$0xff] (%p1694_p3), %v286_v1  ;;  %v290_v3 = vld [vmem:[%s250_s8 + $0x48] sm:$0xff] (%p1694_p3) }
  0x3b   : > { %289 = vst [vmem:[%s248_s17 + $0x10] sm:$0xff] (%p1694_p3), %v288_v2  ;;  %291 = vst [vmem:[%s248_s17 + $0x18] sm:$0xff] (%p1694_p3), %v290_v3 }
  0x3d PF: > { %p1695_p5 = scmp.ne.s32.totalorder %s1692_s14, 0 }
  0x3e   : > { %s1494_s11 = sand.u32 (!%p1695_p5), 1, %s1342_s25   ;;  %p1696_p6 = scmp.eq.s32.totalorder (!%p1695_p5), %s1422_s28, 0 }
  0x3f   : > { %300 = sbr.rel (%p1695_p5) target bundleno = 750 (0x2ee), region = 82  ;;  %s988_s16 = sshll.u32 (!%p1695_p5), %s1494_s11, 5 }
  0x40   : > { %s305_s9 = scalar_lea.vmem (!%p1695_p5), [#allocation2], %s988_s16 }
  0x46   : > { %1329 = dma.done.wait (%p1696_p6), [#allocation4], 512   ;;  %p1697_p10 = pmov %p1696_p6 }
  0x47   : > { %v1355_v4 = vmov 1.0|1.0   ;;  %v1356_v5 = vmov 0   ;;  %v338_v6 = vld [vmem:[%s305_s9] sm:$0xff]  ;;  %v339_v7 = vld [vmem:[%s305_s9 + $0x8] sm:$0xff]  ;;  %v340_v8 = vld [vmem:[%s305_s9 + $0x10] sm:$0xff] }
  0x48   : > { %1331 = vsyncadd (%p1697_p10), [#allocation4], 4294966784  ;;  %1113 = vmatprep.subr.bf16.mxu0 %v1355_v4  ;;  %1227 = vset.pattern.permute.xlu1 %v1356_v5  ;;  %1228 = vtanh.f32 %v338_v6  ;;  %v341_v9 = vld [vmem:[%s305_s9 + $0x18] sm:$0xff]  ;;  %v386_v10 = vld [vmem:[%s1679_s1] sm:$0xff]  ;;  %s990_s20 = sshll.u32 %s1494_s11, 4  ;;  %s1004_s23 = sshll.u32 %s1422_s28, 7 }
  0x49   : > { %1114 = vmatpush3.bf16.msra.mxu0 %v1355_v4  ;;  %1226 = vset.pattern.permute.xlu0 %v1356_v5  ;;  %1230 = vtanh.f32 %v339_v7  ;;  %v610_v11 = vld [vmem:[%s1681_s3] sm:$0xff]  ;;  %v611_v13 = vld [vmem:[%s1681_s3 + $0x8] sm:$0xff]  ;;  %v557_v15 = vld [vmem:[%s1680_s2 + $0x18] sm:$0xff]  ;;  %s337_s21 = scalar_lea.vmem [#allocation6], %s990_s20  ;;  %s1635_s17 = scalar_lea.hbm %s1685_s7, %s1004_s23 }
  0x4a   : > { %1115 = vmatprep.subr.bf16.mxu0 %v1355_v4  ;;  %1101 = vmatprep.mubr.f32.mxu0 %v386_v10  ;;  %1232 = vtanh.f32 %v340_v8  ;;  %v554_v12 = vld [vmem:[%s1680_s2] sm:$0xff]  ;;  %v555_v14 = vld [vmem:[%s1680_s2 + $0x8] sm:$0xff]  ;;  %v556_v16 = vld [vmem:[%s1680_s2 + $0x10] sm:$0xff]  ;;  %s901_s22 = sshll.u32 %s337_s21, 4  ;;  %s889_s16 = scalar_lea.sflag [#allocation5], %s1494_s11  ;;  %s1630_s22 = int_to_ptr.vmem [resolvable:$true] %s901_s22 }
  0x4b   : > { %1234 = vtanh.f32 %v341_v9  ;;  %620 = vperm.xlu1 %1227, %v610_v11   ;;  %564 = vperm.xlu0 %1226, %v554_v12   ;;  %v613_v28 = vld [vmem:[%s1681_s3 + $0x18] sm:$0xff]  ;;  %v612_v33 = vld [vmem:[%s1681_s3 + $0x10] sm:$0xff]  ;;  %v559_v45 = vld [vmem:[%s1680_s2 + $0x28] sm:$0xff]  ;;  %s1284_s28 = scalar_lea.vmem %s1630_s22, 256  ;;  %p1698_p12 = scmp.ne.s32.totalorder %s1690_s12, 0 }
  0x4c   : > { %v558_v50 = vld [vmem:[%s1680_s2 + $0x20] sm:$0xff]  ;;  %v615_v60 = vld [vmem:[%s1681_s3 + $0x28] sm:$0xff]  ;;  %v561_v6 = vld [vmem:[%s1680_s2 + $0x38] sm:$0xff]  ;;  %p1285_p11 = scmp.ne.s32.totalorder %s1630_s22, %s1284_s28  ;;  %s1357_s9 = smov [#allocation6]  }
  0x4d   : > { %1116 = vmatpush3.bf16.msra.mxu0 %v1355_v4  ;;  %v614_v0 = vld [vmem:[%s1681_s3 + $0x20] sm:$0xff]  ;;  %v560_v10 = vld [vmem:[%s1680_s2 + $0x30] sm:$0xff]  ;;  %v617_v11 = vld [vmem:[%s1681_s3 + $0x38] sm:$0xff]  ;;  %s1288_s14 = sshll.u32 %s1357_s9, 4  ;;  %s1289_s14 = int_to_ptr.vmem [resolvable:$false] %s1288_s14 }
  0x4e   : > { %p1286_p0 = pnand %p1285_p11, %p1698_p12  ;;  %s1290_s15 = scalar_lea.vmem %s1289_s14, 512 }
  0x4f   : > { %625 = vperm.xlu1 %1227, %v611_v13   ;;  %569 = vperm.xlu0 %1226, %v555_v14   ;;  %v616_v13 = vld [vmem:[%s1681_s3 + $0x30] sm:$0xff]  ;;  %v859_v14 = vld [vmem:[%s1683_s5 + $0x8] sm:$0xff]  ;;  %p1291_p4 = scmp.lt.s32.totalorder %s1630_s22, %s1289_s14  ;;  %p1292_p7 = scmp.lt.s32.totalorder %s1290_s15, %s1284_s28 }
  0x50   : > { %p1287_p2 = pneg %p1286_p0 }
  0x51   : > { %p1293_p8 = por %p1292_p7, %p1291_p4 }
  0x52   : > { %v1229_v17 = vpop.eup %1228 }
  0x53   : > { %v1231_v18 = vpop.eup %1230  ;;  %v346_v19 = vsub.f32 0.5, %v1229_v17  ;;  %v350_v20 = vsub.f32 2.5, %v1229_v17  ;;  %579 = vperm.xlu1 %1227, %v557_v15   ;;  %574 = vperm.xlu0 %1226, %v556_v16   ;;  %v366_v35 = vsub.f32 4.5, %v1229_v17  ;;  %v858_v15 = vld [vmem:[%s1683_s5] sm:$0xff]  ;;  %v387_v16 = vld [vmem:[%s1679_s1 + $0x8] sm:$0xff]  ;;  %p1294_p9 = pnand %p1293_p8, %p1287_p2 }
  0x54   : > { %v1233_v21 = vpop.eup %1232  ;;  %v347_v22 = vsub.f32 0.5, %v1231_v18  ;;  %v351_v23 = vsub.f32 2.5, %v1231_v18  ;;  %v367_v39 = vsub.f32 4.5, %v1231_v18  ;;  %v873_v17 = vld [vmem:[%s1684_s6 + $0x8] sm:$0xff]  ;;  %v388_v18 = vld [vmem:[%s1679_s1 + $0x10] sm:$0xff] }
  0x55   : > { %v1235_v24 = vpop.eup %1234  ;;  %v348_v25 = vsub.f32 0.5, %v1233_v21  ;;  %v354_v26 = vmul.f32 %v350_v20, %v346_v19  ;;  %v352_v27 = vsub.f32 2.5, %v1233_v21  ;;  %v368_v43 = vsub.f32 4.5, %v1233_v21  ;;  %v389_v20 = vld [vmem:[%s1679_s1 + $0x18] sm:$0xff]  ;;  %v390_v21 = vld [vmem:[%s1679_s1 + $0x20] sm:$0xff] }
  0x56   : > { %v1117_v29 = vpack.c.bf16 %v347_v22, %v346_v19  ;;  %v349_v30 = vsub.f32 0.5, %v1235_v24  ;;  %v355_v31 = vmul.f32 %v351_v23, %v347_v22  ;;  %v353_v32 = vsub.f32 2.5, %v1235_v24  ;;  %v392_v23 = vld [vmem:[%s1679_s1 + $0x30] sm:$0xff] }
  0x57   : > { %v991_v34 = vadd.f32 -0.5, %v354_v26  ;;  %v356_v36 = vmul.f32 %v352_v27, %v348_v25  ;;  %635 = vperm.xlu1 %1227, %v613_v28   ;;  %v374_v44 = vmul.f32 1.5, %v346_v19  ;;  %630 = vperm.xlu0 %1226, %v612_v33   ;;  %v369_v48 = vsub.f32 4.5, %v1235_v24  ;;  %v872_v19 = vld [vmem:[%s1684_s6] sm:$0xff]  ;;  %v393_v24 = vld [vmem:[%s1679_s1 + $0x38] sm:$0xff] }
  0x58   : > { %1118 = vmatprep.subr.bf16.mxu0 %v1117_v29  ;;  %v1121_v37 = vpack.c.bf16 %v349_v30, %v348_v25  ;;  %v992_v38 = vadd.f32 -0.5, %v355_v31  ;;  %v357_v40 = vmul.f32 %v353_v32, %v349_v30  ;;  %v375_v49 = vmul.f32 1.5, %v347_v22  ;;  %v391_v22 = vld [vmem:[%s1679_s1 + $0x28] sm:$0xff] }
  0x59   : > { %1120 = vmatpush3.bf16.msra.mxu0 %v1117_v29  ;;  %v362_v41 = vmul.f32 0.5, %v991_v34  ;;  %v993_v42 = vadd.f32 -0.5, %v356_v36  ;;  %v376_v53 = vmul.f32 1.5, %v348_v25  ;;  %v377_v57 = vmul.f32 1.5, %v349_v30  ;;  %v755_v31 = vld [vmem:[#allocation3 + $0x8] sm:$0xff] }
  0x5a   : > { %1122 = vmatprep.subr.bf16.mxu0 %v1121_v37  ;;  %v363_v46 = vmul.f32 0.5, %v992_v38  ;;  %v994_v47 = vadd.f32 -0.5, %v357_v40  ;;  %822 = vmatprep.mubr.f32.mxu1 %v755_v31 }
  0x5b   : > { %v370_v51 = vmul.f32 %v366_v35, %v362_v41  ;;  %v364_v52 = vmul.f32 0.5, %v993_v42  ;;  %589 = vperm.xlu1 %1227, %v559_v45   ;;  %584 = vperm.xlu0 %1226, %v558_v50  }
  0x5c   : > { %v371_v54 = vmul.f32 %v367_v39, %v363_v46  ;;  %v1125_v55 = vpack.c.bf16 %v363_v46, %v362_v41  ;;  %v365_v56 = vmul.f32 0.5, %v994_v47 }
  0x5d   : > { %1124 = vmatpush3.bf16.msra.mxu0 %v1121_v37  ;;  %v372_v58 = vmul.f32 %v368_v43, %v364_v52  ;;  %v378_v59 = vsub.f32 %v370_v51, %v374_v44 }
  0x5e   : > { %1126 = vmatprep.subr.bf16.mxu0 %v1125_v55  ;;  %v373_v61 = vmul.f32 %v369_v48, %v365_v56  ;;  %v1129_v62 = vpack.c.bf16 %v365_v56, %v364_v52  ;;  %v379_v63 = vsub.f32 %v371_v54, %v375_v49 }
  0x5f   : > { %v382_v1 = vmul.f32 0.33333334, %v378_v59  ;;  %v380_v2 = vsub.f32 %v372_v58, %v376_v53  ;;  %645 = vperm.xlu1 %1227, %v615_v60   ;;  %640 = vperm.xlu0 %1226, %v614_v0  }
  0x60   : > { %v383_v3 = vmul.f32 0.33333334, %v379_v63  ;;  %v381_v5 = vsub.f32 %v373_v61, %v377_v57 }
  0x61   : > { %1128 = vmatpush3.bf16.msra.mxu0 %v1125_v55  ;;  %v384_v8 = vmul.f32 0.33333334, %v380_v2 }
  0x62   : > { %1130 = vmatprep.subr.bf16.mxu0 %v1129_v62  ;;  %v1133_v7 = vpack.c.bf16 %v383_v3, %v382_v1  ;;  %v385_v9 = vmul.f32 0.33333334, %v381_v5 }
  0x63   : > { %599 = vperm.xlu1 %1227, %v561_v6   ;;  %594 = vperm.xlu0 %1226, %v560_v10  }
  0x64   : > { %v1137_v12 = vpack.c.bf16 %v385_v9, %v384_v8 }
  0x65   : > { %1132 = vmatpush3.bf16.msra.mxu0 %v1129_v62 }
  0x66   : > { %1134 = vmatprep.subr.bf16.mxu0 %v1133_v7 }
  0x67   : > { %655 = vperm.xlu1 %1227, %v617_v11   ;;  %650 = vperm.xlu0 %1226, %v616_v13  }
  0x69   : > { %1136 = vmatpush3.bf16.msra.mxu0 %v1133_v7 }
  0x6a   : > { %1138 = vmatprep.subr.bf16.mxu0 %v1137_v12 }
  0x6b   : > { %867 = vperm.xlu1 %1227, %v859_v14   ;;  %862 = vperm.xlu0 %1226, %v858_v15  }
  0x6d   : > { %1140 = vmatpush3.bf16.msra.mxu0 %v1137_v12 }
  0x6f   : > { %881 = vperm.xlu1 %1227, %v873_v17   ;;  %876 = vperm.xlu0 %1226, %v872_v19  }
  0x70   : > { %1102 = vmatmul.mubr.f32.vlgmr.msra.gmra.mrb[0].mxu0 %v387_v16 }
  0x71   : > { %1104 = vmatprep.mubr.f32.mxu0 %v388_v18 }
  0x74   : > { %1105 = vmatmul.mubr.f32.gmra.mrb[2].mxu0 %v389_v20 }
  0x75   : > { %1107 = vmatprep.mubr.f32.mxu0 %v390_v21 }
  0x78   : > { %1108 = vmatmul.mubr.f32.gmra.mrb[4].mxu0 %v391_v22 }
  0x79   : > { %1110 = vmatprep.mubr.f32.mxu0 %v392_v23 }
  0x7c   : > { %1111 = vmatmul.mubr.f32.gmra.mrb[6].mxu0 %v393_v24 }
  0xca   : > { %v565_v5 = vpop.permute.xlu0 %564  ;;  %v621_v6 = vpop.permute.xlu1 %620 }
  0xce   : > { %v570_v11 = vpop.permute.xlu0 %569  ;;  %v626_v12 = vpop.permute.xlu1 %625 }
  0xd2   : > { %v575_v16 = vpop.permute.xlu0 %574  ;;  %v580_v17 = vpop.permute.xlu1 %579 }
  0xd6   : > { %v631_v21 = vpop.permute.xlu0 %630  ;;  %v636_v22 = vpop.permute.xlu1 %635 }
  0xda   : > { %v585_v24 = vpop.permute.xlu0 %584 }
 0x143   : > { %v1103_v25 = vpop.f32.mrb[0].mxu0 }
 0x144   : > { %v460_v26 = vpop.f32.mrb[1].mxu0 }
 0x145   : > { %v499_v27 = vadd.f32 %v1103_v25, %v460_v26 }
 0x147   : > { %v1106_v28 = vpop.f32.mrb[2].mxu0 }
 0x148   : > { %v470_v29 = vpop.f32.mrb[3].mxu0 }
 0x149   : > { %v500_v30 = vadd.f32 %v499_v27, %v470_v29 }
 0x14b   : > { %v1109_v32 = vpop.f32.mrb[4].mxu0  ;;  %v501_v33 = vadd.f32 %v1106_v28, %v500_v30 }
 0x14c   : > { %v480_v34 = vpop.f32.mrb[5].mxu0 }
 0x14d   : > { %v502_v35 = vadd.f32 %v501_v33, %v480_v34 }
 0x14f   : > { %v1112_v36 = vpop.f32.mrb[6].mxu0  ;;  %v503_v37 = vadd.f32 %v1109_v32, %v502_v35 }
 0x150   : > { %v490_v38 = vpop.f32.mrb[7].mxu0 }
 0x151   : > { %v504_v39 = vadd.f32 %v503_v37, %v490_v38 }
 0x153   : > { %v505_v40 = vadd.f32 %v1112_v36, %v504_v39 }
 0x155   : > { %v506_v41 = vrot.slane %v505_v40, 4 }
 0x157   : > { %v507_v42 = vadd.f32 %v506_v41, %v505_v40 }
 0x159   : > { %v508_v43 = vrot.slane %v507_v42, 2 }
 0x15b   : > { %v509_v44 = vadd.f32 %v508_v43, %v507_v42 }
 0x15d   : > { %v510_v45 = vrot.slane %v509_v44, 1 }
 0x15f   : > { %v511_v46 = vadd.f32 %v510_v45, %v509_v44 }
 0x161   : > { %v513_v47 = vmul.f32 0.015625, %v511_v46 }
 0x163   : > { %v514_v48 = vsub.f32 %v460_v26, %v513_v47  ;;  %v515_v49 = vsub.f32 %v1103_v25, %v513_v47  ;;  %v516_v50 = vsub.f32 %v470_v29, %v513_v47  ;;  %v517_v51 = vsub.f32 %v1106_v28, %v513_v47  ;;  %v590_v25 = vpop.permute.xlu1 %589  ;;  %v641_v26 = vpop.permute.xlu0 %640 }
 0x164   : > { %v518_v52 = vsub.f32 %v480_v34, %v513_v47  ;;  %v519_v53 = vsub.f32 %v1109_v32, %v513_v47  ;;  %v520_v54 = vsub.f32 %v490_v38, %v513_v47  ;;  %v521_v55 = vsub.f32 %v1112_v36, %v513_v47 }
 0x165   : > { %v522_v56 = vmul.f32 %v514_v48, %v514_v48  ;;  %v523_v57 = vmul.f32 %v515_v49, %v515_v49  ;;  %v524_v58 = vmul.f32 %v516_v50, %v516_v50  ;;  %v525_v60 = vmul.f32 %v517_v51, %v517_v51 }
 0x166   : > { %v526_v62 = vmul.f32 %v518_v52, %v518_v52  ;;  %v527_v0 = vmul.f32 %v519_v53, %v519_v53  ;;  %v528_v2 = vmul.f32 %v520_v54, %v520_v54  ;;  %v529_v7 = vmul.f32 %v521_v55, %v521_v55 }
 0x167   : > { %v530_v59 = vadd.f32 %v523_v57, %v522_v56  ;;  %v646_v27 = vpop.permute.xlu1 %645  ;;  %v595_v43 = vpop.permute.xlu0 %594 }
 0x169   : > { %v531_v61 = vadd.f32 %v530_v59, %v524_v58 }
 0x16b   : > { %v532_v63 = vadd.f32 %v531_v61, %v525_v60  ;;  %v600_v47 = vpop.permute.xlu1 %599 }
 0x16d   : > { %v533_v1 = vadd.f32 %v532_v63, %v526_v62 }
 0x16f   : > { %v534_v3 = vadd.f32 %v533_v1, %v527_v0 }
 0x171   : > { %v535_v8 = vadd.f32 %v534_v3, %v528_v2 }
 0x173   : > { %v536_v9 = vadd.f32 %v535_v8, %v529_v7 }
 0x175   : > { %v537_v10 = vrot.slane %v536_v9, 4 }
 0x177   : > { %v538_v13 = vadd.f32 %v537_v10, %v536_v9 }
 0x179   : > { %v539_v14 = vrot.slane %v538_v13, 2 }
 0x17b   : > { %v540_v15 = vadd.f32 %v539_v14, %v538_v13 }
 0x17d   : > { %v541_v18 = vrot.slane %v540_v15, 1 }
 0x17f   : > { %v542_v19 = vadd.f32 %v541_v18, %v540_v15 }
 0x181   : > { %v543_v20 = vmul.f32 0.015625, %v542_v19 }
 0x183   : > { %v544_v23 = vadd.f32 1e-05, %v543_v20 }
 0x185   : > { %1236 = vrsqrt.f32 %v544_v23 }
 0x18f   : > { %v1237_v28 = vpop.eup %1236 }
 0x190   : > { %v546_v29 = vmul.f32 %v1237_v28, %v514_v48  ;;  %v547_v30 = vmul.f32 %v1237_v28, %v515_v49  ;;  %v549_v31 = vmul.f32 %v1237_v28, %v517_v51  ;;  %v548_v32 = vmul.f32 %v1237_v28, %v516_v50 }
 0x191   : > { %v551_v33 = vmul.f32 %v1237_v28, %v519_v53  ;;  %v550_v34 = vmul.f32 %v1237_v28, %v518_v52  ;;  %v553_v35 = vmul.f32 %v1237_v28, %v521_v55  ;;  %v552_v36 = vmul.f32 %v1237_v28, %v520_v54  ;;  %v651_v52 = vpop.permute.xlu0 %650  ;;  %v656_v53 = vpop.permute.xlu1 %655 }
 0x192   : > { %v602_v37 = vmul.f32 %v565_v5, %v546_v29  ;;  %v603_v38 = vmul.f32 %v570_v11, %v547_v30  ;;  %v605_v39 = vmul.f32 %v580_v17, %v549_v31  ;;  %v604_v40 = vmul.f32 %v575_v16, %v548_v32 }
 0x193   : > { %v607_v41 = vmul.f32 %v590_v25, %v551_v33  ;;  %v606_v42 = vmul.f32 %v585_v24, %v550_v34  ;;  %v608_v49 = vmul.f32 %v595_v43, %v552_v36  ;;  %v609_v51 = vmul.f32 %v600_v47, %v553_v35 }
 0x194   : > { %v658_v44 = vadd.f32 %v621_v6, %v602_v37  ;;  %v659_v45 = vadd.f32 %v626_v12, %v603_v38  ;;  %v661_v46 = vadd.f32 %v636_v22, %v605_v39  ;;  %v660_v56 = vadd.f32 %v631_v21, %v604_v40 }
 0x195   : > { %v663_v48 = vadd.f32 %v646_v27, %v607_v41  ;;  %v662_v50 = vadd.f32 %v641_v26, %v606_v42  ;;  %v664_v54 = vadd.f32 %v651_v52, %v608_v49  ;;  %v665_v55 = vadd.f32 %v656_v53, %v609_v51 }
 0x196   : > { %1238 = vtanh.f32 %v658_v44 }
 0x197   : > { %1240 = vtanh.f32 %v659_v45 }
 0x198   : > { %1242 = vtanh.f32 %v661_v46 }
 0x199   : > { %1244 = vtanh.f32 %v660_v56 }
 0x19a   : > { %1246 = vtanh.f32 %v663_v48 }
 0x19b   : > { %1248 = vtanh.f32 %v662_v50 }
 0x19c   : > { %1250 = vtanh.f32 %v664_v54 }
 0x19d   : > { %1252 = vtanh.f32 %v665_v55 }
 0x1a0   : > { %v1239_v57 = vpop.eup %1238 }
 0x1a1   : > { %v1241_v58 = vpop.eup %1240  ;;  %v1589_v59 = vsub.f32 0.5, %v1239_v57  ;;  %v682_v60 = vsub.f32 2.5, %v1239_v57  ;;  %v714_v0 = vsub.f32 4.5, %v1239_v57 }
 0x1a2   : > { %v1243_v61 = vpop.eup %1242  ;;  %v1591_v62 = vsub.f32 0.5, %v1241_v58  ;;  %v683_v63 = vsub.f32 2.5, %v1241_v58  ;;  %v715_v3 = vsub.f32 4.5, %v1241_v58 }
 0x1a3   : > { %v1245_v1 = vpop.eup %1244  ;;  %v690_v2 = vmul.f32 %v682_v60, %v1589_v59  ;;  %v1594_v5 = vsub.f32 0.5, %v1243_v61  ;;  %v685_v6 = vsub.f32 2.5, %v1243_v61  ;;  %v730_v9 = vmul.f32 1.5, %v1589_v59 }
 0x1a4   : > { %v1247_v7 = vpop.eup %1246  ;;  %v691_v8 = vmul.f32 %v683_v63, %v1591_v62  ;;  %v1598_v10 = vsub.f32 0.5, %v1245_v1  ;;  %v684_v11 = vsub.f32 2.5, %v1245_v1  ;;  %v731_v14 = vmul.f32 1.5, %v1591_v62 }
 0x1a5   : > { %v1249_v12 = vpop.eup %1248  ;;  %v995_v13 = vadd.f32 -0.5, %v690_v2  ;;  %v693_v15 = vmul.f32 %v685_v6, %v1594_v5  ;;  %v716_v16 = vsub.f32 4.5, %v1245_v1  ;;  %v1605_v20 = vsub.f32 0.5, %v1247_v7 }
 0x1a6   : > { %v996_v17 = vadd.f32 -0.5, %v691_v8  ;;  %v692_v18 = vmul.f32 %v684_v11, %v1598_v10  ;;  %v1603_v19 = vsub.f32 0.5, %v1249_v12  ;;  %v686_v23 = vsub.f32 2.5, %v1249_v12  ;;  %v1251_v25 = vpop.eup %1250 }
 0x1a7   : > { %v706_v21 = vmul.f32 0.5, %v995_v13  ;;  %v998_v22 = vadd.f32 -0.5, %v693_v15  ;;  %v687_v24 = vsub.f32 2.5, %v1247_v7  ;;  %v717_v28 = vsub.f32 4.5, %v1243_v61  ;;  %v1253_v30 = vpop.eup %1252 }
 0x1a8   : > { %v707_v26 = vmul.f32 0.5, %v996_v17  ;;  %v997_v27 = vadd.f32 -0.5, %v692_v18  ;;  %v718_v29 = vsub.f32 4.5, %v1249_v12  ;;  %v694_v33 = vmul.f32 %v686_v23, %v1603_v19 }
 0x1a9   : > { %v722_v31 = vmul.f32 %v714_v0, %v706_v21  ;;  %v709_v32 = vmul.f32 0.5, %v998_v22  ;;  %v695_v34 = vmul.f32 %v687_v24, %v1605_v20  ;;  %v719_v38 = vsub.f32 4.5, %v1247_v7 }
 0x1aa   : > { %v723_v35 = vmul.f32 %v715_v3, %v707_v26  ;;  %v1141_v36 = vpack.c.bf16 %v707_v26, %v706_v21  ;;  %v708_v37 = vmul.f32 0.5, %v997_v27  ;;  %v999_v40 = vadd.f32 -0.5, %v694_v33  ;;  %v756_v33 = vld [vmem:[#allocation3 + $0x10] sm:$0xff] }
 0x1ab   : > { %v738_v39 = vsub.f32 %v722_v31, %v730_v9  ;;  %v1000_v41 = vadd.f32 -0.5, %v695_v34  ;;  %v1609_v42 = vsub.f32 0.5, %v1251_v25  ;;  %v725_v44 = vmul.f32 %v717_v28, %v709_v32  ;;  %v754_v31 = vld [vmem:[#allocation3] sm:$0xff] }
 0x1ac   : > { %v739_v43 = vsub.f32 %v723_v35, %v731_v14  ;;  %1142 = vmatprep.subr.bf16.mxu1 %v1141_v36  ;;  %v1144_v45 = vpack.c.bf16 %v709_v32, %v708_v37  ;;  %v681_v46 = vsub.f32 0.5, %v1253_v30  ;;  %v710_v47 = vmul.f32 0.5, %v999_v40  ;;  %v757_v32 = vld [vmem:[#allocation3 + $0x18] sm:$0xff] }
 0x1ad   : > { %1143 = vmatpush3.bf16.msra.mxu1 %v1355_v4  ;;  %v711_v56 = vmul.f32 0.5, %v1000_v41  ;;  %v688_v48 = vsub.f32 2.5, %v1251_v25  ;;  %v689_v49 = vsub.f32 2.5, %v1253_v30  ;;  %v724_v50 = vmul.f32 %v716_v16, %v708_v37 }
 0x1ae   : > { %1145 = vmatprep.subr.bf16.mxu1 %v1144_v45  ;;  %v720_v51 = vsub.f32 4.5, %v1251_v25  ;;  %v746_v52 = vmul.f32 0.33333334, %v738_v39  ;;  %v747_v53 = vmul.f32 0.33333334, %v739_v43  ;;  %v726_v54 = vmul.f32 %v718_v29, %v710_v47 }
 0x1af   : > { %v727_v55 = vmul.f32 %v719_v38, %v711_v56  ;;  %v1147_v57 = vpack.c.bf16 %v711_v56, %v710_v47  ;;  %v696_v58 = vmul.f32 %v688_v48, %v1609_v42  ;;  %v697_v60 = vmul.f32 %v689_v49, %v681_v46 }
 0x1b0   : > { %v1153_v61 = vpack.c.bf16 %v747_v53, %v746_v52  ;;  %v1155_v63 = vpack.c.bf16 %v1591_v62, %v1589_v59  ;;  %v732_v0 = vmul.f32 1.5, %v1598_v10  ;;  %v733_v2 = vmul.f32 1.5, %v1594_v5 }
 0x1b1   : > { %1146 = vmatpush3.bf16.msra.mxu1 %v1355_v4  ;;  %v1001_v1 = vadd.f32 -0.5, %v696_v58  ;;  %v1159_v3 = vpack.c.bf16 %v1594_v5, %v1598_v10  ;;  %v734_v6 = vmul.f32 1.5, %v1603_v19  ;;  %v1002_v7 = vadd.f32 -0.5, %v697_v60 }
 0x1b2   : > { %1148 = vmatprep.subr.bf16.mxu1 %v1147_v57  ;;  %v740_v8 = vsub.f32 %v724_v50, %v732_v0  ;;  %v735_v9 = vmul.f32 1.5, %v1605_v20  ;;  %v1163_v59 = vpack.c.bf16 %v1605_v20, %v1603_v19  ;;  %v721_v11 = vsub.f32 4.5, %v1253_v30 }
 0x1b3   : > { %v712_v62 = vmul.f32 0.5, %v1001_v1  ;;  %v741_v12 = vsub.f32 %v725_v44, %v733_v2  ;;  %v742_v13 = vsub.f32 %v726_v54, %v734_v6  ;;  %v713_v14 = vmul.f32 0.5, %v1002_v7 }
 0x1b4   : > { %v748_v15 = vmul.f32 0.33333334, %v740_v8  ;;  %v743_v16 = vsub.f32 %v727_v55, %v735_v9  ;;  %v736_v17 = vmul.f32 1.5, %v1609_v42  ;;  %v1167_v21 = vpack.c.bf16 %v681_v46, %v1609_v42 }
 0x1b5   : > { %1149 = vmatpush3.bf16.msra.mxu1 %v1355_v4  ;;  %v728_v5 = vmul.f32 %v720_v51, %v712_v62  ;;  %v749_v10 = vmul.f32 0.33333334, %v741_v12  ;;  %v750_v18 = vmul.f32 0.33333334, %v742_v13  ;;  %v729_v22 = vmul.f32 %v721_v11, %v713_v14 }
 0x1b6   : > { %v1150_v23 = vpack.c.bf16 %v713_v14, %v712_v62  ;;  %v751_v24 = vmul.f32 0.33333334, %v743_v16  ;;  %v737_v19 = vmul.f32 1.5, %v681_v46 }
 0x1b7   : > { %v1157_v20 = vpack.c.bf16 %v749_v10, %v748_v15  ;;  %v744_v25 = vsub.f32 %v728_v5, %v736_v17 }
 0x1b8   : > { %1151 = vmatprep.subr.bf16.mxu1 %v1150_v23  ;;  %v1161_v26 = vpack.c.bf16 %v751_v24, %v750_v18  ;;  %v745_v27 = vsub.f32 %v729_v22, %v737_v19 }
 0x1b9   : > { %1152 = vmatpush3.bf16.msra.mxu1 %v1355_v4  ;;  %v752_v28 = vmul.f32 0.33333334, %v744_v25 }
 0x1ba   : > { %1154 = vmatprep.subr.bf16.mxu1 %v1153_v61  ;;  %v753_v29 = vmul.f32 0.33333334, %v745_v27  ;;  %v868_v61 = vpop.permute.xlu1 %867 }
 0x1bc   : > { %v1165_v30 = vpack.c.bf16 %v753_v29, %v752_v28 }
 0x1bd   : > { %1156 = vmatpush3.bf16.msra.mxu1 %v1155_v63  ;;  %v863_v63 = vpop.permute.xlu0 %862 }
 0x1be   : > { %1158 = vmatprep.subr.bf16.mxu1 %v1157_v20  ;;  %v882_v7 = vpop.permute.xlu1 %881 }
 0x1c1   : > { %1160 = vmatpush3.bf16.msra.mxu1 %v1159_v3  ;;  %v877_v8 = vpop.permute.xlu0 %876 }
 0x1c2   : > { %1162 = vmatprep.subr.bf16.mxu1 %v1161_v26 }
 0x1c5   : > { %1164 = vmatpush3.bf16.msra.mxu1 %v1163_v59 }
 0x1c6   : > { %1166 = vmatprep.subr.bf16.mxu1 %v1165_v30 }
 0x1c9   : > { %1168 = vmatpush3.bf16.msra.mxu1 %v1167_v21 }
 0x1cc   : > { %823 = vmatmul.mubr.f32.vlgmr.msra.gmra.mrb[0].mxu1 %v754_v31 }
 0x1cd   : > { %827 = vmatprep.mubr.f32.mxu1 %v757_v32 }
 0x1d0   : > { %828 = vmatmul.mubr.f32.gmra.mrb[2].mxu1 %v756_v33 }
 0x29f   : > { %v1063_v34 = vpop.f32.mrb[0].mxu1 }
 0x2a0   : > { %v1064_v35 = vpop.f32.mrb[1].mxu1 }
 0x2a1   : > { %v1065_v4 = vadd.f32 %v1064_v35, %v1063_v34 }
 0x2a3   : > { %v1066_v36 = vpop.f32.mrb[2].mxu1 }
 0x2a4   : > { %v1067_v37 = vpop.f32.mrb[3].mxu1 }
 0x2a5   : > { %v1068_v38 = vadd.f32 %v1067_v37, %v1066_v36 }
 0x2a7   : > { %v833_v39 = vadd.f32 %v1068_v38, %v1065_v4 }
 0x2a9   : > { %v834_v40 = vrot.slane %v833_v39, 4 }
 0x2ab   : > { %v835_v41 = vadd.f32 %v834_v40, %v833_v39 }
 0x2ad   : > { %v836_v42 = vrot.slane %v835_v41, 2 }
 0x2af   : > { %v837_v43 = vadd.f32 %v836_v42, %v835_v41 }
 0x2b1   : > { %v838_v44 = vrot.slane %v837_v43, 1 }
 0x2b3   : > { %v839_v45 = vadd.f32 %v838_v44, %v837_v43 }
 0x2b5   : > { %v841_v46 = vmul.f32 0.0625, %v839_v45 }
 0x2b7   : > { %v842_v47 = vsub.f32 %v1065_v4, %v841_v46  ;;  %v843_v56 = vsub.f32 %v1068_v38, %v841_v46 }
 0x2b9   : > { %v844_v48 = vmul.f32 %v842_v47, %v842_v47  ;;  %v845_v49 = vmul.f32 %v843_v56, %v843_v56 }
 0x2bb   : > { %v846_v50 = vadd.f32 %v845_v49, %v844_v48 }
 0x2bd   : > { %v847_v51 = vrot.slane %v846_v50, 4 }
 0x2bf   : > { %v848_v52 = vadd.f32 %v847_v51, %v846_v50 }
 0x2c1   : > { %v849_v53 = vrot.slane %v848_v52, 2 }
 0x2c3   : > { %v850_v54 = vadd.f32 %v849_v53, %v848_v52 }
 0x2c5   : > { %v851_v55 = vrot.slane %v850_v54, 1 }
 0x2c7   : > { %v852_v57 = vadd.f32 %v851_v55, %v850_v54 }
 0x2c9   : > { %v853_v58 = vmul.f32 0.0625, %v852_v57 }
 0x2cb   : > { %v854_v60 = vadd.f32 1e-05, %v853_v58 }
 0x2cd   : > { %1254 = vrsqrt.f32 %v854_v60 }
 0x2d7   : > { %v1255_v0 = vpop.eup %1254 }
 0x2d8   : > { %v856_v1 = vmul.f32 %v1255_v0, %v842_v47  ;;  %v857_v2 = vmul.f32 %v1255_v0, %v843_v56 }
 0x2da   : > { %v870_v3 = vmul.f32 %v863_v63, %v856_v1  ;;  %v871_v6 = vmul.f32 %v868_v61, %v857_v2 }
 0x2dc   : > { %v884_v9 = vadd.f32 %v877_v8, %v870_v3  ;;  %v885_v59 = vadd.f32 %v882_v7, %v871_v6 }
 0x2de   : > { %886 = vst [vmem:[%s337_s21] sm:$0xff] %v884_v9  ;;  %887 = vst [vmem:[%s337_s21 + $0x8] sm:$0xff] %v885_v59 }
 0x2df   : > { %1297 = shalt.err (!%p1294_p9)
}
 0x2e0   : > { %s1298_s18 = scalar_lea.hbm %s1635_s17, 256  ;;  %s1302_s21 = scalar_lea.hbm %s1685_s7, 768 }
 0x2e1   : > { %p1299_p13 = scmp.ne.s32.totalorder %s1635_s17, %s1298_s18  ;;  %p1303_p5 = scmp.lt.u32.totalorder %s1635_s17, %s1685_s7 }
 0x2e2   : > { %p1304_p6 = scmp.lt.u32.totalorder %s1302_s21, %s1298_s18  ;;  %p1306_p11 = scmp.lt.u32.totalorder %s1298_s18, %s1635_s17 }
 0x2e3   : > { %p1300_p1 = pnand %p1299_p13, %p1698_p12 }
 0x2e4   : > { %p1305_p10 = por %p1304_p6, %p1303_p5 }
 0x2e5   : > { %p1301_p3 = pneg %p1300_p1 }
 0x2e6   : > { %p1307_p0 = por %p1306_p11, %p1305_p10 }
 0x2e8   : > { %p1308_p2 = pnand %p1307_p0, %p1301_p3 }
 0x2ea   : > { %1311 = shalt.err (!%p1308_p2)
}
 0x2eb   : > { %s1358_s8 = smov 128   ;;  %s1359_s28 = smov 384  }
 0x2ec   : > { %s1360_s9 = smov 8  }
 0x2ed   : > { %1173 = dma.vmem_to_hbm [thread:$0]  (%p1698_p12), %s1630_s22, 256, %s1635_s17, %s889_s16, %s1358_s8, %s1359_s28, %s1360_s9  }
 0x2ee PF: > { %p1185_p4 = scmp.ge.s32.totalorder %s1350_s27, 2  ;;  %s916_s14 = sand.u32 1, %s1338_s24  }
 0x2ef   : > { %p1699_p7 = scmp.ne.s32.totalorder %s1691_s13, 0  ;;  %s917_s15 = scalar_lea.sflag [#allocation5], %s916_s14 }
 0x2f1   : > { %p1180_p8 = pnand %p1185_p4, %p1699_p7 }
 0x2f3   : > { %1333 = dma.done.wait (!%p1180_p8), %s917_s15, 256  }
 0x2f4   : > { %1335 = vsyncadd (!%p1180_p8), %s917_s15, 4294967040  ;;  %p18_p9 = scmp.ge.s32.totalorder %s1426_s30, 5   ;;  %s1700_s24 = smov %s1342_s25 }
 0x2f5   : > { %s1701_s25 = smov %s1346_s26  ;;  %s1702_s26 = smov %s1438_s10 }
 0x2f6   : > { %s1703_s27 = smov %s1426_s30  ;;  %20 = sbr.rel (!%p18_p9) target bundleno = 4 (0x4), region = 131 }
 0x2fd   :  { %922 = vsyncpa [#allocation4], 1 }
 0x2fe   :  { %924 = vsyncpa [#allocation4 + $0x1], 1 }
 0x2ff   :  { %925 = vsyncpa [#allocation5], 1 }
 0x300   :  { %927 = vsyncpa [#allocation5 + $0x1], 1 }

</bundles_post_ra>
